<compile_context>
chip_gen: v7x
topology: tpu7x:2x2x1
jax: 0.10.0
libtpu: 0.0.40
codegen_flags: <defaults>
</compile_context>

<pallas_src>
import jax
import jax.numpy as jnp
from jax import lax
from jax.experimental import pallas as pl
from jax.experimental.pallas import tpu as pltpu


def _feature_similarity_l2_kernel(rows_ref, cols_ref, rown_ref, coln_ref, out_ref):
    # rows_ref: (row_tile, D)   row block of features
    # cols_ref: (col_tile, D)   column block of features (untransposed)
    # rown_ref: (row_tile, 1)   precomputed squared row norms (f32)
    # coln_ref: (1, col_tile)   precomputed squared column norms (f32)
    # out_ref:  (row_tile, col_tile)
    row_tile, col_tile = out_ref.shape

    # Cross term on the MXU with f32 accumulation; contract the last dim of
    # both operands (no transposed copy of the features needed).
    cross = lax.dot_general(
        rows_ref[...], cols_ref[...],
        dimension_numbers=(((1,), (1,)), ((), ())),
        preferred_element_type=jnp.float32,
        precision=lax.Precision.HIGHEST,
    )

    d2 = rown_ref[...] + coln_ref[...] - 2.0 * cross
    # Rounding can make d2 slightly negative -> NaN in sqrt; clamp, and force
    # the true diagonal to exactly 0 (as in the diff-and-norm reference).
    d2 = jnp.maximum(d2, 0.0)
    row_ids = (pl.program_id(0) * row_tile
               + lax.broadcasted_iota(jnp.int32, (row_tile, col_tile), 0))
    col_ids = (pl.program_id(1) * col_tile
               + lax.broadcasted_iota(jnp.int32, (row_tile, col_tile), 1))
    d2 = jnp.where(row_ids == col_ids, 0.0, d2)

    out_ref[...] = (-jnp.sqrt(d2)).astype(out_ref.dtype)


def _round_up(x, m):
    return ((x + m - 1) // m) * m


def _pick_tile(n_pad, candidates):
    for c in candidates:
        if n_pad % c == 0:
            return c
    return n_pad


def feature_similarity_l2(features: jax.Array, *, row_tile: int | None = None,
                          col_tile: int | None = None) -> jax.Array:
    """Negative pairwise L2-distance matrix of feature vectors (Pallas TPU)."""
    n, d = features.shape

    # Lane-dense output: pad N up to a multiple of 128; trim at the end.
    n_pad = _round_up(n, 128)

    if col_tile is None:
        col_tile = _pick_tile(n_pad, (1024, 512, 256, 128))
    if row_tile is None:
        row_tile = _pick_tile(n_pad, (256, 128, 64, 32, 16, 8))

    # Keep the leading parallel axis >= 2 steps for small N so both v7x
    # TensorCores get work.
    while n_pad // row_tile < 2 and row_tile >= 16:
        row_tile //= 2

    # Crude VMEM guard with full-D input blocks (double-buffered inputs + out).
    # TODO(synk): for very large D, add a third "arbitrary" K grid axis over D
    # with a VMEM f32 accumulator instead of shrinking the output tile.
    itemsize = jnp.dtype(features.dtype).itemsize

    def _vmem_bytes(rt, ct):
        return (2 * (rt + ct) * d * itemsize   # double-buffered feature blocks
                + 2 * rt * ct * itemsize       # double-buffered output tile
                + 2 * (rt + ct) * 4)           # norm side inputs

    budget = 24 * 1024 * 1024
    while _vmem_bytes(row_tile, col_tile) > budget and col_tile > 128:
        col_tile //= 2
    while _vmem_bytes(row_tile, col_tile) > budget and row_tile > 8:
        row_tile //= 2

    assert n_pad % col_tile == 0 and n_pad % row_tile == 0

    feats = features
    if n_pad != n:
        feats = jnp.pad(features, ((0, n_pad - n), (0, 0)))

    # O(N*D) squared norms, precomputed once in f32 (padded rows give 0).
    sq = jnp.sum(jnp.square(feats.astype(jnp.float32)), axis=-1)
    row_norms = sq[:, None]          # (n_pad, 1)
    col_norms = sq[None, :]          # (1, n_pad)

    out = pl.pallas_call(
        _feature_similarity_l2_kernel,
        out_shape=jax.ShapeDtypeStruct((n_pad, n_pad), features.dtype),
        grid_spec=pltpu.PrefetchScalarGridSpec(
            num_scalar_prefetch=0,
            grid=(n_pad // row_tile, n_pad // col_tile),
            in_specs=[
                # row block of features: (row_tile, D)
                pl.BlockSpec((row_tile, d), lambda i, j: (i, 0)),
                # column block of features (untransposed): (col_tile, D)
                pl.BlockSpec((col_tile, d), lambda i, j: (j, 0)),
                # squared norms of the row / column blocks
                pl.BlockSpec((row_tile, 1), lambda i, j: (i, 0)),
                pl.BlockSpec((1, col_tile), lambda i, j: (0, j)),
            ],
            out_specs=pl.BlockSpec((row_tile, col_tile), lambda i, j: (i, j)),
        ),
        compiler_params=pltpu.CompilerParams(
            dimension_semantics=("parallel", "parallel"),
        ),
    )(feats, feats, row_norms, col_norms)

    if n_pad != n:
        out = out[:n, :n]
    return out


if __name__ == "__main__":
    key = jax.random.PRNGKey(0)
    # Small shapes: batch of 16 samples, 8-dim feature vectors.
    N, D = 16, 8
    features = jax.random.normal(key, (N, D), dtype=jnp.float32)

    out = feature_similarity_l2(features)
    out = jax.block_until_ready(out)

    # Reference check against plain JAX (same semantics as the torch module).
    ref = -jnp.linalg.norm(features[:, None, :] - features[None, :, :], axis=-1)
    assert out.shape == (N, N)
    assert jnp.allclose(out, ref, atol=1e-4, rtol=1e-4), "mismatch vs reference"

    print("KERNEL_OK")
</pallas_src>

<mosaic_0001>
module attributes {stable_mosaic.version = 11 : i64} {
  func.func @_feature_similarity_l2_kernel(%arg0: i32, %arg1: i32, %arg2: memref<64x8xf32, #tpu.memory_space<vmem>>, %arg3: memref<128x8xf32, #tpu.memory_space<vmem>>, %arg4: memref<64x1xf32, #tpu.memory_space<vmem>>, %arg5: memref<1x128xf32, #tpu.memory_space<vmem>>, %arg6: memref<64x128xf32, #tpu.memory_space<vmem>>) attributes {dimension_semantics = [#tpu.dimension_semantics<parallel>, #tpu.dimension_semantics<parallel>], iteration_bounds = array<i64: 2, 1>, scalar_prefetch = 0 : i64, scratch_operands = 0 : i64, tpu.core_type = #tpu.core_type<tc>, window_params = [{transform_indices = @transform_0, window_bounds = array<i64: 64, 8>}, {transform_indices = @transform_1, window_bounds = array<i64: 128, 8>}, {transform_indices = @transform_2, window_bounds = array<i64: 64, 1>}, {transform_indices = @transform_3, window_bounds = array<i64: 1, 128>}, {transform_indices = @transform_4, window_bounds = array<i64: 64, 128>}]} {
    %c0 = arith.constant 0 : index
    %c0_0 = arith.constant 0 : index
    %0 = vector.load %arg2[%c0, %c0_0] : memref<64x8xf32, #tpu.memory_space<vmem>>, vector<64x8xf32>
    %c0_1 = arith.constant 0 : index
    %c0_2 = arith.constant 0 : index
    %1 = vector.load %arg3[%c0_1, %c0_2] : memref<128x8xf32, #tpu.memory_space<vmem>>, vector<128x8xf32>
    %cst = arith.constant dense<0.000000e+00> : vector<64x128xf32>
    %2 = tpu.matmul %0, %1, %cst {dimension_numbers = #tpu.dot_dimension_numbers<[1], [1], [0], [0], [0, 0, 1, 0], [], []>, precision = #tpu.contract_precision<fp32>} : vector<64x8xf32>, vector<128x8xf32>, vector<64x128xf32> -> vector<64x128xf32>
    %c0_3 = arith.constant 0 : index
    %c0_4 = arith.constant 0 : index
    %3 = vector.load %arg4[%c0_3, %c0_4] : memref<64x1xf32, #tpu.memory_space<vmem>>, vector<64x1xf32>
    %c0_5 = arith.constant 0 : index
    %c0_6 = arith.constant 0 : index
    %4 = vector.load %arg5[%c0_5, %c0_6] : memref<1x128xf32, #tpu.memory_space<vmem>>, vector<1x128xf32>
    %5 = vector.broadcast %3 : vector<64x1xf32> to vector<64x128xf32>
    %6 = vector.broadcast %4 : vector<1x128xf32> to vector<64x128xf32>
    %7 = arith.addf %5, %6 : vector<64x128xf32>
    %cst_7 = arith.constant 2.000000e+00 : f32
    %8 = vector.broadcast %cst_7 : f32 to vector<64x128xf32>
    %9 = arith.mulf %8, %2 : vector<64x128xf32>
    %10 = arith.subf %7, %9 : vector<64x128xf32>
    %cst_8 = arith.constant 0.000000e+00 : f32
    %11 = vector.broadcast %cst_8 : f32 to vector<64x128xf32>
    %12 = arith.maximumf %10, %11 : vector<64x128xf32>
    %c64_i32 = arith.constant 64 : i32
    %13 = arith.muli %arg0, %c64_i32 : i32
    %14 = tpu.iota {dimensions = array<i32: 0>} : vector<64x128xi32>
    %15 = vector.broadcast %13 : i32 to vector<64x128xi32>
    %16 = arith.addi %15, %14 : vector<64x128xi32>
    %c128_i32 = arith.constant 128 : i32
    %17 = arith.muli %arg1, %c128_i32 : i32
    %18 = tpu.iota {dimensions = array<i32: 1>} : vector<64x128xi32>
    %19 = vector.broadcast %17 : i32 to vector<64x128xi32>
    %20 = arith.addi %19, %18 : vector<64x128xi32>
    %21 = arith.cmpi eq, %16, %20 : vector<64x128xi32>
    %cst_9 = arith.constant 0.000000e+00 : f32
    %22 = vector.broadcast %cst_9 : f32 to vector<64x128xf32>
    %23 = arith.select %21, %22, %12 : vector<64x128xi1>, vector<64x128xf32>
    %24 = math.sqrt %23 : vector<64x128xf32>
    %cst_10 = arith.constant 0.000000e+00 : f32
    %25 = vector.broadcast %cst_10 : f32 to vector<64x128xf32>
    %26 = arith.subf %25, %24 : vector<64x128xf32>
    %c0_11 = arith.constant 0 : index
    %c0_12 = arith.constant 0 : index
    %27 = vector.load %arg6[%c0_11, %c0_12] : memref<64x128xf32, #tpu.memory_space<vmem>>, vector<64x128xf32>
    tpu.vector_store %arg6[%c0_11, %c0_12], %26 {strides = array<i32>} : memref<64x128xf32, #tpu.memory_space<vmem>>, vector<64x128xf32>,
    return
  }
  func.func @transform_0(%arg0: i32, %arg1: i32) -> (i32, i32) {
    %c0_i32 = arith.constant 0 : i32
    %c0_i32_0 = arith.constant 0 : i32
    return %arg0, %c0_i32 : i32, i32
  }
  func.func @transform_1(%arg0: i32, %arg1: i32) -> (i32, i32) {
    %c0_i32 = arith.constant 0 : i32
    %c0_i32_0 = arith.constant 0 : i32
    return %arg1, %c0_i32 : i32, i32
  }
  func.func @transform_2(%arg0: i32, %arg1: i32) -> (i32, i32) {
    %c0_i32 = arith.constant 0 : i32
    %c0_i32_0 = arith.constant 0 : i32
    return %arg0, %c0_i32 : i32, i32
  }
  func.func @transform_3(%arg0: i32, %arg1: i32) -> (i32, i32) {
    %c0_i32 = arith.constant 0 : i32
    %c0_i32_0 = arith.constant 0 : i32
    return %c0_i32, %arg1 : i32, i32
  }
  func.func @transform_4(%arg0: i32, %arg1: i32) -> (i32, i32) {
    %c0_i32 = arith.constant 0 : i32
    return %arg0, %arg1 : i32, i32
  }
}

</mosaic_0001>

<bundles_post_ra>
// kernel: tpu_custom_call.1
= control target key start
LH: loop header
LB: loop body
LE: loop exit
PB: predicated region body
PF: predicated region fallthrough
CT: control target
= control target key end

     0   :  { %9 = vsyncpa [#allocation3], 0  ;;  %s3105_s0 = inlined_call_operand.vmem [shape: f32[128,8], index: 0, kind: input, shape index: {}]   ;;  %s3106_s1 = inlined_call_operand.vmem [shape: f32[128,8], index: 1, kind: input, shape index: {}]   ;;  %s3107_s2 = inlined_call_operand.vmem [shape: f32[128,1], index: 2, kind: input, shape index: {}]   ;;  %s3108_s3 = inlined_call_operand.vmem [shape: f32[1,128], index: 3, kind: input, shape index: {}]   ;;  %s3109_s4 = inlined_call_operand.hbm [shape: f32[128,128], index: 4, kind: output, shape index: {}]  }
   0x1   :  { %11 = vsyncpa [#allocation3 + $0x1], 0  ;;  %s2480_s15 = smov 0   ;;  %s2482_s16 = smov 0  }
   0x2   :  { %s2484_s17 = smov 0   ;;  %s2486_s18 = smov 0  }
   0x3   :  { %s2488_s19 = smov 0   ;;  %s2490_s20 = smov 0  }
   0x4 LB: > { %s1635_s21 = sadd.s32 4294967295, %s2449_s20   ;;  %s1636_s22 = sadd.s32 4294967294, %s2449_s20   ;;  %s2449_s20 = sphi %s2490_s20, %s17_s20   ;;  %s2445_s19 = sphi %s2488_s19, %s3139_s19   ;;  %s2441_s18 = sphi %s2486_s18, %s3138_s18   ;;  %s2437_s17 = sphi %s2484_s17, %s3137_s17   ;;  %s2433_s16 = sphi %s2482_s16, %s3136_s16   ;;  %s2429_s15 = sphi %s2480_s15, %s3135_s15  }
   0x5   : > { %s29_s23 = sadd.s32 1, %s2445_s19  ;;  %s142_s24 = sadd.s32 1, %s2437_s17 }
   0x6   : > { %p31_p0 = scmp.ge.s32.totalorder %s29_s23, 2  ;;  %p152_p1 = scmp.ne.s32.totalorder %s2437_s17, %s2433_s16 }
   0x7   : > { %p153_p2 = scmp.eq.s32.totalorder %s1635_s21, 1  ;;  %p158_p3 = scmp.ne.s32.totalorder %s2433_s16, %s2429_s15 }
   0x8   : > { %s3141_s23 = smov (%p31_p0, %s29_s23), 0  ;;  %p159_p5 = scmp.eq.s32.totalorder %s1636_s22, 1 }
   0x9   : > { %p2520_p4 = por %p153_p2, %p152_p1  ;;  %s137_s26 = ssub.s32 %s2445_s19, %s3141_s23 }
   0xa   : > { %p1641_p6 = scmp.ge.s32.totalorder %s2449_s20, 1  ;;  %p140_p7 = scmp.eq.s32.totalorder %s137_s26, 0 }
   0xb   : > { %p2527_p8 = por %p159_p5, %p158_p3  ;;  %p210_p9 = scmp.lt.s32.totalorder %s2449_s20, 3 }
   0xc   : > { %s2533_s28 = scalar_select %p140_p7, %s2437_s17, %s142_s24  }
   0xd   : > { %p211_p10 = pnand %p1641_p6, %p210_p9 }
   0xf   : > { %214 = sbr.rel (%p211_p10) target bundleno = 486 (0x1e6), region = 36 }
  0x16   : > { %v279_v0 = vld [vmem:[%s3106_s1] sm:$0xff]  ;;  %v280_v1 = vld [vmem:[%s3106_s1 + $0x8] sm:$0xff]  ;;  %vm295_vm0 = vcmask 64512   ;;  %v281_v2 = vld [vmem:[%s3106_s1 + $0x10] sm:$0xff]  ;;  %s1643_s21 = sshll.u32 %s2441_s18, 3  ;;  %s246_s14 = sand.u32 1, %s2433_s16  }
  0x17   : > { %v2545_v3 = vsel %vm295_vm0, %v279_v0, 0  ;;  %v2548_v4 = vsel %vm295_vm0, %v280_v1, 0  ;;  %v282_v5 = vld [vmem:[%s3106_s1 + $0x18] sm:$0xff]  ;;  %v2554_v6 = vsel %vm295_vm0, %v281_v2, 0  ;;  %v283_v11 = vld [vmem:[%s3106_s1 + $0x20] sm:$0xff]  ;;  %v284_v12 = vld [vmem:[%s3106_s1 + $0x28] sm:$0xff] }
  0x18   : > { %v369_v7 = vand.u32 4294901760, %v2545_v3  ;;  %v372_v8 = vand.u32 4294901760, %v2548_v4  ;;  %v2559_v9 = vsel %vm295_vm0, %v282_v5, 0  ;;  %v375_v10 = vand.u32 4294901760, %v2554_v6  ;;  %p250_p11 = scmp.lt.s32.totalorder %s1643_s21, 15  ;;  %v285_v20 = vld [vmem:[%s3106_s1 + $0x30] sm:$0xff] }
  0x19   : > { %v378_v13 = vand.u32 4294901760, %v2559_v9  ;;  %v2583_v16 = vsel %vm295_vm0, %v283_v11, 0  ;;  %v2586_v17 = vsel %vm295_vm0, %v284_v12, 0  ;;  %v286_v21 = vld [vmem:[%s3106_s1 + $0x38] sm:$0xff]  ;;  %v339_v24 = vsel %vm295_vm0, %v285_v20, 0  ;;  %v287_v31 = vld [vmem:[%s3106_s1 + $0x40] sm:$0xff] }
  0x1a   : > { %v2574_v14 = vpack.c.bf16 %v372_v8, %v369_v7  ;;  %v381_v18 = vand.u32 4294901760, %v2583_v16  ;;  %v384_v19 = vand.u32 4294901760, %v2586_v17  ;;  %s3143_s21 = smov (!%p250_p11, %s1643_s21), 15  ;;  %v342_v25 = vsel %vm295_vm0, %v286_v21, 0  ;;  %v288_v32 = vld [vmem:[%s3106_s1 + $0x48] sm:$0xff]  ;;  %v289_v41 = vld [vmem:[%s3106_s1 + $0x50] sm:$0xff] }
  0x1b   : > { %v2580_v15 = vpack.c.bf16 %v378_v13, %v375_v10  ;;  %s1644_s30 = sshll.u32 %s3143_s21, 3  ;;  %v387_v28 = vand.u32 4294901760, %v339_v24  ;;  %v390_v29 = vand.u32 4294901760, %v342_v25  ;;  %v345_v36 = vsel %vm295_vm0, %v287_v31, 0  ;;  %v290_v42 = vld [vmem:[%s3106_s1 + $0x58] sm:$0xff]  ;;  %v291_v48 = vld [vmem:[%s3106_s1 + $0x60] sm:$0xff] }
  0x1c   : > { %2064 = vmatprep.subr.bf16.mxu1 %v2574_v14  ;;  %2160 = vmatprep.subr.bf16.mxu0 %v2574_v14  ;;  %s2610_s7 = scalar_lea.vmem %s3105_s0, %s1644_s30  ;;  %v2612_v22 = vpack.c.bf16 %v384_v19, %v381_v18  ;;  %v348_v37 = vsel %vm295_vm0, %v288_v32, 0  ;;  %v393_v39 = vand.u32 4294901760, %v345_v36  ;;  %v351_v44 = vsel %vm295_vm0, %v289_v41, 0  ;;  %v292_v49 = vld [vmem:[%s3106_s1 + $0x68] sm:$0xff]  ;;  %s2857_s12 = scalar_lea.vmem %s3107_s2, %s1644_s30 }
  0x1d   : > { %2066 = vmatpush3.bf16.xpose.msra.mxu1 %v2574_v14  ;;  %2162 = vmatpush3.bf16.xpose.msra.mxu0 %v2574_v14  ;;  %v271_v23 = vld [vmem:[%s2610_s7] sm:$0xff]  ;;  %v2634_v34 = vpack.c.bf16 %v390_v29, %v387_v28  ;;  %v396_v40 = vand.u32 4294901760, %v348_v37  ;;  %v354_v45 = vsel %vm295_vm0, %v290_v42, 0  ;;  %v399_v46 = vand.u32 4294901760, %v351_v44  ;;  %v272_v12 = vld [vmem:[%s2610_s7 + $0x8] sm:$0xff]  ;;  %v273_v20 = vld [vmem:[%s2610_s7 + $0x10] sm:$0xff] }
  0x1e   : > { %2068 = vmatprep.subr.bf16.mxu1 %v2580_v15  ;;  %2164 = vmatprep.subr.bf16.mxu0 %v2580_v15  ;;  %v297_v26 = vsel %vm295_vm0, %v271_v23, 0  ;;  %v402_v47 = vand.u32 4294901760, %v354_v45  ;;  %v357_v51 = vsel %vm295_vm0, %v291_v48, 0  ;;  %v360_v52 = vsel %vm295_vm0, %v292_v49, 0  ;;  %v277_v48 = vld [vmem:[%s2610_s7 + $0x30] sm:$0xff]  ;;  %s1648_s21 = sshll.u32 %s2441_s18, 6 }
  0x1f   : > { %v2618_v27 = vand.u32 4294901760, %v297_v26  ;;  %v2649_v43 = vpack.c.bf16 %v396_v40, %v393_v39  ;;  %v2670_v53 = vsub.f32 %v2545_v3, %v369_v7  ;;  %v2675_v54 = vsub.f32 %v2548_v4, %v372_v8  ;;  %v294_v7 = vld [vmem:[%s3106_s1 + $0x78] sm:$0xff]  ;;  %s1642_s22 = sshll.u32 %s246_s14, 6  ;;  %s1654_s26 = sshll.u32 %s2441_s18, 10 }
  0x20   : > { %v2663_v50 = vpack.c.bf16 %v402_v47, %v399_v46  ;;  %v2680_v55 = vsub.f32 %v2554_v6, %v375_v10  ;;  %v2685_v56 = vsub.f32 %v2559_v9, %v378_v13  ;;  %v2688_v57 = vsub.f32 %v2583_v16, %v381_v18  ;;  %v293_v6 = vld [vmem:[%s3106_s1 + $0x70] sm:$0xff]  ;;  %s3027_s24 = scalar_lea.vmem [#allocation2], %s1642_s22  ;;  %s3052_s8 = scalar_lea.hbm %s3109_s4, %s1654_s26 }
  0x21   : > { %v2625_v30 = vsub.f32 %v297_v26, %v2618_v27  ;;  %v405_v58 = vand.u32 4294901760, %v357_v51  ;;  %v2693_v59 = vsub.f32 %v2586_v17, %v384_v19  ;;  %v2695_v60 = vsub.f32 %v339_v24, %v387_v28  ;;  %v274_v28 = vld [vmem:[%s2610_s7 + $0x18] sm:$0xff]  ;;  %s1524_s29 = sshll.u32 %s3027_s24, 4  ;;  %s3059_s18 = scalar_lea.sflag [#allocation3], %s246_s14  ;;  %s3054_s29 = int_to_ptr.vmem [resolvable:$true] %s1524_s29 }
  0x22   : > { %v2697_v61 = vsub.f32 %v342_v25, %v390_v29  ;;  %v408_v62 = vand.u32 4294901760, %v360_v52  ;;  %v2701_v63 = vsub.f32 %v345_v36, %v393_v39  ;;  %v2703_v0 = vsub.f32 %v348_v37, %v396_v40  ;;  %v275_v29 = vld [vmem:[%s2610_s7 + $0x20] sm:$0xff]  ;;  %v276_v39 = vld [vmem:[%s2610_s7 + $0x28] sm:$0xff]  ;;  %s2371_s9 = scalar_lea.vmem %s3054_s29, 1024  ;;  %s2452_s10 = smov [#allocation2]  }
  0x23   : > { %v451_v33 = vand.u32 4294901760, %v2625_v30  ;;  %v2707_v1 = vpack.c.bf16 %v2675_v54, %v2670_v53  ;;  %v2709_v2 = vsub.f32 %v351_v44, %v399_v46  ;;  %v2711_v3 = vsub.f32 %v354_v45, %v402_v47  ;;  %p2372_p12 = scmp.ne.s32.totalorder %s3054_s29, %s2371_s9 }
  0x24   : > { %v2715_v4 = vpack.c.bf16 %v2685_v56, %v2680_v55  ;;  %v2719_v5 = vpack.c.bf16 %v2693_v59, %v2688_v57  ;;  %v2729_v8 = vpack.c.bf16 %v2697_v61, %v2695_v60  ;;  %v2733_v9 = vpack.c.bf16 %v2703_v0, %v2701_v63 }
  0x25   : > { %2070 = vmatpush3.bf16.xpose.msra.mxu1 %v2580_v15  ;;  %2166 = vmatpush3.bf16.xpose.msra.mxu0 %v2580_v15  ;;  %v452_v35 = vsub.f32 %v2625_v30, %v451_v33  ;;  %v2737_v10 = vpack.c.bf16 %v2711_v3, %v2709_v2  ;;  %v2739_v11 = vpack.c.bf16 %v408_v62, %v405_v58  ;;  %v363_v13 = vsel %vm295_vm0, %v293_v6, 0  ;;  %p2373_p13 = pnand %p2372_p12, %p2520_p4 }
  0x26   : > { %2072 = vmatprep.subr.bf16.mxu1 %v2612_v22  ;;  %2168 = vmatprep.subr.bf16.mxu0 %v2612_v22  ;;  %v366_v16 = vsel %vm295_vm0, %v294_v7, 0  ;;  %v2744_v17 = vsub.f32 %v357_v51, %v405_v58  ;;  %v2746_v18 = vsub.f32 %v360_v52, %v408_v62  ;;  %v300_v19 = vsel %vm295_vm0, %v272_v12, 0  ;;  %v278_v58 = vld [vmem:[%s2610_s7 + $0x38] sm:$0xff]  ;;  %s2375_s7 = sshll.u32 %s2452_s10, 4  ;;  %s2376_s7 = int_to_ptr.vmem [resolvable:$false] %s2375_s7 }
  0x27   : > { %1963 = vmatprep.mubr.f32.mxu0 %v451_v33  ;;  %v453_v38 = vand.u32 4294901760, %v452_v35  ;;  %3121 = vst [vmem:[#allocation5_spill] sm:$0xff] %v2739_v11  ;;  %v411_v23 = vand.u32 4294901760, %v363_v13  ;;  %v414_v24 = vand.u32 4294901760, %v366_v16  ;;  %v532_v25 = vand.u32 4294901760, %v2670_v53  ;;  %p2374_p0 = pneg %p2373_p13  ;;  %s2377_s11 = scalar_lea.vmem %s2376_s7, 2048 }
  0x28   : > { %v2754_v21 = vpack.c.bf16 %v2746_v18, %v2744_v17  ;;  %v539_v26 = vand.u32 4294901760, %v2675_v54  ;;  %v2762_v31 = vand.u32 4294901760, %v300_v19  ;;  %v303_v32 = vsel %vm295_vm0, %v273_v20, 0  ;;  %p2378_p1 = scmp.lt.s32.totalorder %s3054_s29, %s2376_s7  ;;  %p2379_p2 = scmp.lt.s32.totalorder %s2377_s11, %s2371_s9 }
  0x29   : > { %1831 = vmatprep.mubr.f32.mxu1 %v453_v38  ;;  %v306_v33 = vsel %vm295_vm0, %v274_v28, 0  ;;  %v2766_v35 = vpack.c.bf16 %v414_v24, %v411_v23  ;;  %v533_v36 = vsub.f32 %v2670_v53, %v532_v25  ;;  %v309_v38 = vsel %vm295_vm0, %v275_v29, 0 }
  0x2a   : > { %3122 = vst [vmem:[#allocation6_spill] sm:$0xff] %v2754_v21  ;;  %v540_v37 = vsub.f32 %v2675_v54, %v539_v26  ;;  %v2772_v40 = vand.u32 4294901760, %v303_v32  ;;  %v2774_v41 = vsub.f32 %v363_v13, %v411_v23  ;;  %v2776_v42 = vsub.f32 %v366_v16, %v414_v24  ;;  %p2380_p3 = por %p2379_p2, %p2378_p1 }
  0x2b   : > { %3123 = vst [vmem:[#allocation7_spill] sm:$0xff] %v2766_v35  ;;  %v2779_v44 = vsub.f32 %v300_v19, %v2762_v31  ;;  %v2781_v45 = vand.u32 4294901760, %v306_v33  ;;  %v2785_v46 = vand.u32 4294901760, %v309_v38  ;;  %v312_v47 = vsel %vm295_vm0, %v276_v39, 0 }
  0x2c   : > { %v2791_v49 = vpack.c.bf16 %v2776_v42, %v2774_v41  ;;  %v534_v51 = vand.u32 4294901760, %v533_v36  ;;  %v541_v52 = vand.u32 4294901760, %v540_v37  ;;  %v546_v53 = vand.u32 4294901760, %v2680_v55  ;;  %p2381_p5 = pnand %p2380_p3, %p2374_p0 }
  0x2d   : > { %2074 = vmatpush3.bf16.xpose.msra.mxu1 %v2612_v22  ;;  %2170 = vmatpush3.bf16.xpose.msra.mxu0 %v2612_v22  ;;  %3124 = vst [vmem:[#allocation8_spill] sm:$0xff] %v2779_v44  ;;  %v553_v54 = vand.u32 4294901760, %v2685_v56  ;;  %v2799_v62 = vsub.f32 %v303_v32, %v2772_v40  ;;  %v461_v6 = vand.u32 4294901760, %v2779_v44  ;;  %v2803_v7 = vsub.f32 %v306_v33, %v2781_v45 }
  0x2e   : > { %2076 = vmatprep.subr.bf16.mxu1 %v2634_v34  ;;  %2172 = vmatprep.subr.bf16.mxu0 %v2634_v34  ;;  %3125 = vst [vmem:[#allocation9_spill] sm:$0xff] %v2791_v49  ;;  %v2805_v12 = vand.u32 4294901760, %v312_v47  ;;  %v315_v13 = vsel %vm295_vm0, %v277_v48, 0  ;;  %v2809_v16 = vsub.f32 %v309_v38, %v2785_v46  ;;  %v318_v19 = vsel %vm295_vm0, %v278_v58, 0 }
  0x2f   : > { %3126 = vst [vmem:[#allocation10_spill] sm:$0xff] %v2799_v62  ;;  %3127 = vst [vmem:[#allocation11_spill] sm:$0xff] %v2803_v7  ;;  %v2095_v20 = vpack.c.bf16 %v541_v52, %v534_v51  ;;  %v2191_v23 = vpack.c.bf16 %v539_v26, %v532_v25  ;;  %v547_v24 = vsub.f32 %v2680_v55, %v546_v53  ;;  %v471_v29 = vand.u32 4294901760, %v2799_v62 }
  0x30   : > { %v554_v28 = vsub.f32 %v2685_v56, %v553_v54  ;;  %v2815_v32 = vand.u32 4294901760, %v315_v13  ;;  %v462_v33 = vsub.f32 %v2779_v44, %v461_v6  ;;  %v481_v36 = vand.u32 4294901760, %v2803_v7 }
  0x31   : > { %v2820_v37 = vsub.f32 %v312_v47, %v2805_v12  ;;  %v2822_v38 = vand.u32 4294901760, %v318_v19  ;;  %v491_v55 = vand.u32 4294901760, %v2809_v16  ;;  %v548_v56 = vand.u32 4294901760, %v547_v24 }
  0x32   : > { %v555_v25 = vand.u32 4294901760, %v554_v28  ;;  %v560_v26 = vand.u32 4294901760, %v2688_v57  ;;  %v567_v39 = vand.u32 4294901760, %v2693_v59  ;;  %v472_v48 = vsub.f32 %v2799_v62, %v471_v29 }
  0x33   : > { %v2831_v47 = vsub.f32 %v315_v13, %v2815_v32  ;;  %v463_v51 = vand.u32 4294901760, %v462_v33  ;;  %v482_v52 = vsub.f32 %v2803_v7, %v481_v36  ;;  %v501_v58 = vand.u32 4294901760, %v2820_v37 }
  0x34   : > { %v2836_v44 = vsub.f32 %v318_v19, %v2822_v38  ;;  %v492_v24 = vsub.f32 %v2809_v16, %v491_v55  ;;  %v2099_v28 = vpack.c.bf16 %v555_v25, %v548_v56  ;;  %v561_v49 = vsub.f32 %v2688_v57, %v560_v26 }
  0x35   : > { %2078 = vmatpush3.bf16.xpose.msra.mxu1 %v2634_v34  ;;  %2174 = vmatpush3.bf16.xpose.msra.mxu0 %v2634_v34  ;;  %v473_v62 = vand.u32 4294901760, %v472_v48  ;;  %v511_v13 = vand.u32 4294901760, %v2831_v47  ;;  %v483_v33 = vand.u32 4294901760, %v482_v52  ;;  %v502_v7 = vsub.f32 %v2820_v37, %v501_v58  ;;  %v1313_v52 = vld [vmem:[%s2857_s12 + $0x18] sm:$0xff] }
  0x36   : > { %2080 = vmatprep.subr.bf16.mxu1 %v2649_v43  ;;  %2176 = vmatprep.subr.bf16.mxu0 %v2649_v43  ;;  %v521_v21 = vand.u32 4294901760, %v2836_v44  ;;  %v493_v19 = vand.u32 4294901760, %v492_v24  ;;  %v574_v57 = vand.u32 4294901760, %v2695_v60 }
  0x37   : > { %v503_v56 = vand.u32 4294901760, %v502_v7 }
  0x38   : > { %v522_v25 = vsub.f32 %v2836_v44, %v521_v21 }
  0x3d   : > { %2082 = vmatpush3.bf16.xpose.msra.mxu1 %v2649_v43  ;;  %2178 = vmatpush3.bf16.xpose.msra.mxu0 %v2649_v43 }
  0x3e   : > { %2084 = vmatprep.subr.bf16.mxu1 %v2663_v50  ;;  %2180 = vmatprep.subr.bf16.mxu0 %v2663_v50 }
  0x45   : > { %2086 = vmatpush3.bf16.xpose.msra.mxu1 %v2663_v50  ;;  %2182 = vmatpush3.bf16.xpose.msra.mxu0 %v2663_v50 }
  0x46   : > { %2088 = vmatprep.subr.bf16.mxu1 %v2739_v11  ;;  %2184 = vmatprep.subr.bf16.mxu0 %v2739_v11 }
  0x4d   : > { %2090 = vmatpush3.bf16.xpose.msra.mxu1 %v2739_v11  ;;  %2186 = vmatpush3.bf16.xpose.msra.mxu0 %v2739_v11  ;;  %v568_v11 = vsub.f32 %v2693_v59, %v567_v39  ;;  %v581_v59 = vand.u32 4294901760, %v2697_v61 }
  0x4e   : > { %2092 = vmatprep.subr.bf16.mxu1 %v2766_v35  ;;  %2188 = vmatprep.subr.bf16.mxu0 %v2766_v35 }
  0x55   : > { %2094 = vmatpush3.bf16.xpose.msra.mxu1 %v2766_v35  ;;  %2190 = vmatpush3.bf16.xpose.msra.mxu0 %v2766_v35  ;;  %v2195_v35 = vpack.c.bf16 %v553_v54, %v546_v53  ;;  %v562_v53 = vand.u32 4294901760, %v561_v49  ;;  %v569_v54 = vand.u32 4294901760, %v568_v11  ;;  %v575_v49 = vsub.f32 %v2695_v60, %v574_v57 }
  0x56   : > { %2096 = vmatprep.subr.bf16.mxu1 %v2095_v20  ;;  %2192 = vmatprep.subr.bf16.mxu0 %v2191_v23  ;;  %v582_v11 = vsub.f32 %v2697_v61, %v581_v59  ;;  %v2203_v60 = vpack.c.bf16 %v581_v59, %v574_v57  ;;  %v1312_v61 = vld [vmem:[%s2857_s12 + $0x10] sm:$0xff]  ;;  %v1317_v59 = vld [vmem:[%s2857_s12 + $0x38] sm:$0xff] }
  0x57   : > { %v576_v7 = vand.u32 4294901760, %v575_v49 }
  0x5c   : > { %1832 = vmatmul.mubr.f32.vlgmr.msra.gmra.mrb[0].mxu1 %v463_v51  ;;  %1964 = vmatmul.mubr.f32.vlgmr.msra.gmra.mrb[0].mxu0 %v461_v6  ;;  %v512_v6 = vsub.f32 %v2831_v47, %v511_v13  ;;  %v2451_v51 = vmov 0  }
  0x5d   : > { %2098 = vmatpush3.bf16.xpose.msra.mxu1 %v2095_v20  ;;  %2194 = vmatpush3.bf16.xpose.msra.mxu0 %v2191_v23  ;;  %v2103_v20 = vpack.c.bf16 %v569_v54, %v562_v53  ;;  %v2199_v23 = vpack.c.bf16 %v567_v39, %v560_v26 }
  0x5e   : > { %2100 = vmatprep.subr.bf16.mxu1 %v2099_v28  ;;  %2196 = vmatprep.subr.bf16.mxu0 %v2195_v35  ;;  %v513_v48 = vand.u32 4294901760, %v512_v6  ;;  %v1316_v6 = vld [vmem:[%s2857_s12 + $0x30] sm:$0xff] }
  0x5f   : > { %1834 = vmatprep.mubr.f32.mxu1 %v473_v62  ;;  %1966 = vmatprep.mubr.f32.mxu0 %v471_v29  ;;  %v523_v62 = vand.u32 4294901760, %v522_v25  ;;  %v583_v29 = vand.u32 4294901760, %v582_v11 }
  0x60   : > { %1835 = vmatmul.mubr.f32.gmra.mrb[2].mxu1 %v483_v33  ;;  %1967 = vmatmul.mubr.f32.gmra.mrb[2].mxu0 %v481_v36  ;;  %v588_v36 = vand.u32 4294901760, %v2701_v63  ;;  %v1314_v33 = vld [vmem:[%s2857_s12 + $0x20] sm:$0xff] }
  0x61   : > { %1837 = vmatprep.mubr.f32.mxu1 %v493_v19  ;;  %1969 = vmatprep.mubr.f32.mxu0 %v491_v55  ;;  %v595_v55 = vand.u32 4294901760, %v2703_v0  ;;  %v2107_v26 = vpack.c.bf16 %v583_v29, %v576_v7  ;;  %v630_v7 = vand.u32 4294901760, %v2774_v41  ;;  %v637_v29 = vand.u32 4294901760, %v2776_v42 }
  0x62   : > { %2354 = vset.pattern.permute.xlu1 %v2451_v51  ;;  %2353 = vset.pattern.permute.xlu0 %v2451_v51 }
  0x63   : > { %v596_v39 = vsub.f32 %v2703_v0, %v595_v55  ;;  %1331 = vperm.xlu1 %2354, %v1312_v61   ;;  %v609_v0 = vand.u32 4294901760, %v2711_v3  ;;  %v2207_v53 = vpack.c.bf16 %v595_v55, %v588_v36  ;;  %v638_v61 = vsub.f32 %v2776_v42, %v637_v29 }
  0x64   : > { %1838 = vmatmul.mubr.f32.gmra.mrb[4].mxu1 %v503_v56  ;;  %1970 = vmatmul.mubr.f32.gmra.mrb[4].mxu0 %v501_v58  ;;  %v1311_v58 = vld [vmem:[%s2857_s12 + $0x8] sm:$0xff] }
  0x65   : > { %2102 = vmatpush3.bf16.xpose.msra.mxu1 %v2099_v28  ;;  %2198 = vmatpush3.bf16.xpose.msra.mxu0 %v2195_v35  ;;  %v1310_v35 = vld [vmem:[%s2857_s12] sm:$0xff]  ;;  %v597_v28 = vand.u32 4294901760, %v596_v39  ;;  %v610_v57 = vsub.f32 %v2711_v3, %v609_v0 }
  0x66   : > { %2104 = vmatprep.subr.bf16.mxu1 %v2103_v20  ;;  %2200 = vmatprep.subr.bf16.mxu0 %v2199_v23 }
  0x67   : > { %1840 = vmatprep.mubr.f32.mxu1 %v513_v48  ;;  %1972 = vmatprep.mubr.f32.mxu0 %v511_v13  ;;  %v1315_v13 = vld [vmem:[%s2857_s12 + $0x28] sm:$0xff]  ;;  %v611_v25 = vand.u32 4294901760, %v610_v57 }
  0x68   : > { %1841 = vmatmul.mubr.f32.gmra.mrb[6].mxu1 %v523_v62  ;;  %1973 = vmatmul.mubr.f32.gmra.mrb[6].mxu0 %v521_v21  ;;  %v589_v21 = vsub.f32 %v2701_v63, %v588_v36  ;;  %v602_v63 = vand.u32 4294901760, %v2709_v2 }
  0x69   : > { %1875 = vmatprep.mubr.f32.mxu1 %v2618_v27  ;;  %2007 = vmatprep.mubr.f32.mxu0 %v2618_v27 }
  0x6a   : > { %1321 = vperm.xlu0 %2353, %v1310_v35   ;;  %v590_v24 = vand.u32 4294901760, %v589_v21  ;;  %1336 = vperm.xlu1 %2354, %v1313_v52   ;;  %v603_v54 = vsub.f32 %v2709_v2, %v602_v63  ;;  %v2211_v2 = vpack.c.bf16 %v609_v0, %v602_v63 }
  0x6c   : > { %v2111_v19 = vpack.c.bf16 %v597_v28, %v590_v24  ;;  %v604_v56 = vand.u32 4294901760, %v603_v54 }
  0x6d   : > { %2106 = vmatpush3.bf16.xpose.msra.mxu1 %v2103_v20  ;;  %2202 = vmatpush3.bf16.xpose.msra.mxu0 %v2199_v23  ;;  %v616_v20 = vand.u32 4294901760, %v2744_v17  ;;  %v623_v23 = vand.u32 4294901760, %v2746_v18 }
  0x6e   : > { %2108 = vmatprep.subr.bf16.mxu1 %v2107_v26  ;;  %2204 = vmatprep.subr.bf16.mxu0 %v2203_v60  ;;  %v2115_v49 = vpack.c.bf16 %v611_v25, %v604_v56 }
  0x6f   : > { %1326 = vperm.xlu0 %2353, %v1311_v58   ;;  %1346 = vperm.xlu1 %2354, %v1315_v13   ;;  %v617_v3 = vsub.f32 %v2744_v17, %v616_v20  ;;  %v624_v11 = vsub.f32 %v2746_v18, %v623_v23  ;;  %v2215_v55 = vpack.c.bf16 %v623_v23, %v616_v20  ;;  %v639_v18 = vand.u32 4294901760, %v638_v61 }
  0x71   : > { %v618_v48 = vand.u32 4294901760, %v617_v3  ;;  %v625_v62 = vand.u32 4294901760, %v624_v11 }
  0x73   : > { %1341 = vperm.xlu0 %2353, %v1314_v33   ;;  %1356 = vperm.xlu1 %2354, %v1317_v59   ;;  %v2119_v36 = vpack.c.bf16 %v625_v62, %v618_v48 }
  0x75   : > { %2110 = vmatpush3.bf16.xpose.msra.mxu1 %v2107_v26  ;;  %2206 = vmatpush3.bf16.xpose.msra.mxu0 %v2203_v60  ;;  %v631_v60 = vsub.f32 %v2774_v41, %v630_v7  ;;  %v2219_v26 = vpack.c.bf16 %v637_v29, %v630_v7 }
  0x76   : > { %2112 = vmatprep.subr.bf16.mxu1 %v2111_v19  ;;  %2208 = vmatprep.subr.bf16.mxu0 %v2207_v53 }
  0x77   : > { %1351 = vperm.xlu0 %2353, %v1316_v6   ;;  %v632_v17 = vand.u32 4294901760, %v631_v60 }
  0x79   : > { %v2123_v35 = vpack.c.bf16 %v639_v18, %v632_v17 }
  0x7d   : > { %2114 = vmatpush3.bf16.xpose.msra.mxu1 %v2111_v19  ;;  %2210 = vmatpush3.bf16.xpose.msra.mxu0 %v2207_v53 }
  0x7e   : > { %2116 = vmatprep.subr.bf16.mxu1 %v2115_v49  ;;  %2212 = vmatprep.subr.bf16.mxu0 %v2211_v2 }
  0x85   : > { %2118 = vmatpush3.bf16.xpose.msra.mxu1 %v2115_v49  ;;  %2214 = vmatpush3.bf16.xpose.msra.mxu0 %v2211_v2 }
  0x86   : > { %2120 = vmatprep.subr.bf16.mxu1 %v2119_v36  ;;  %2216 = vmatprep.subr.bf16.mxu0 %v2215_v55 }
  0x8d   : > { %2122 = vmatpush3.bf16.xpose.msra.mxu1 %v2119_v36  ;;  %2218 = vmatpush3.bf16.xpose.msra.mxu0 %v2215_v55 }
  0x8e   : > { %2124 = vmatprep.subr.bf16.mxu1 %v2123_v35  ;;  %2220 = vmatprep.subr.bf16.mxu0 %v2219_v26 }
  0x95   : > { %2126 = vmatpush3.bf16.xpose.msra.mxu1 %v2123_v35  ;;  %2222 = vmatpush3.bf16.xpose.msra.mxu0 %v2219_v26 }
  0x96   : > { %2128 = vmatprep.subr.bf16.mxu1 %v2707_v1  ;;  %2224 = vmatprep.subr.bf16.mxu0 %v2574_v14 }
  0x9c   : > { %1876 = vmatmul.mubr.f32.vlgmr.msra.gmra.mrb[0].mxu1 %v2762_v31  ;;  %2008 = vmatmul.mubr.f32.vlgmr.msra.gmra.mrb[0].mxu0 %v2762_v31 }
  0x9d   : > { %2130 = vmatpush3.bf16.xpose.msra.mxu1 %v2707_v1  ;;  %2226 = vmatpush3.bf16.xpose.msra.mxu0 %v2574_v14  ;;  %v3128_v14 = vld [vmem:[#allocation6_spill] sm:$0xff] }
  0x9e   : > { %2132 = vmatprep.subr.bf16.mxu1 %v2715_v4  ;;  %2228 = vmatprep.subr.bf16.mxu0 %v2580_v15 }
  0x9f   : > { %1878 = vmatprep.mubr.f32.mxu1 %v2772_v40  ;;  %2010 = vmatprep.mubr.f32.mxu0 %v2772_v40 }
  0xa0   : > { %1879 = vmatmul.mubr.f32.gmra.mrb[2].mxu1 %v2781_v45  ;;  %2011 = vmatmul.mubr.f32.gmra.mrb[2].mxu0 %v2781_v45 }
  0xa1   : > { %1881 = vmatprep.mubr.f32.mxu1 %v2785_v46  ;;  %2013 = vmatprep.mubr.f32.mxu0 %v2785_v46 }
  0xa4   : > { %1882 = vmatmul.mubr.f32.gmra.mrb[4].mxu1 %v2805_v12  ;;  %2014 = vmatmul.mubr.f32.gmra.mrb[4].mxu0 %v2805_v12 }
  0xa5   : > { %2134 = vmatpush3.bf16.xpose.msra.mxu1 %v2715_v4  ;;  %2230 = vmatpush3.bf16.xpose.msra.mxu0 %v2580_v15  ;;  %v3129_v15 = vld [vmem:[#allocation5_spill] sm:$0xff] }
  0xa6   : > { %2136 = vmatprep.subr.bf16.mxu1 %v2719_v5  ;;  %2232 = vmatprep.subr.bf16.mxu0 %v2612_v22 }
  0xa7   : > { %1884 = vmatprep.mubr.f32.mxu1 %v2815_v32  ;;  %2016 = vmatprep.mubr.f32.mxu0 %v2815_v32 }
  0xa8   : > { %1885 = vmatmul.mubr.f32.gmra.mrb[6].mxu1 %v2822_v38  ;;  %2017 = vmatmul.mubr.f32.gmra.mrb[6].mxu0 %v2822_v38 }
  0xa9   : > { %1919 = vmatprep.mubr.f32.mxu1 %v2625_v30  ;;  %2051 = vmatprep.mubr.f32.mxu0 %v2618_v27  ;;  %v3131_v27 = vld [vmem:[#allocation7_spill] sm:$0xff]  ;;  %v3132_v30 = vld [vmem:[#allocation8_spill] sm:$0xff] }
  0xad   : > { %2138 = vmatpush3.bf16.xpose.msra.mxu1 %v2719_v5  ;;  %2234 = vmatpush3.bf16.xpose.msra.mxu0 %v2612_v22  ;;  %v3130_v22 = vld [vmem:[#allocation9_spill] sm:$0xff] }
  0xae   : > { %2140 = vmatprep.subr.bf16.mxu1 %v2729_v8  ;;  %2236 = vmatprep.subr.bf16.mxu0 %v2634_v34 }
  0xb5   : > { %2142 = vmatpush3.bf16.xpose.msra.mxu1 %v2729_v8  ;;  %2238 = vmatpush3.bf16.xpose.msra.mxu0 %v2634_v34  ;;  %v3133_v34 = vld [vmem:[#allocation10_spill] sm:$0xff] }
  0xb6   : > { %2144 = vmatprep.subr.bf16.mxu1 %v2733_v9  ;;  %2240 = vmatprep.subr.bf16.mxu0 %v2649_v43 }
  0xbd   : > { %2146 = vmatpush3.bf16.xpose.msra.mxu1 %v2733_v9  ;;  %2242 = vmatpush3.bf16.xpose.msra.mxu0 %v2649_v43  ;;  %v3134_v43 = vld [vmem:[#allocation11_spill] sm:$0xff] }
  0xbe   : > { %2148 = vmatprep.subr.bf16.mxu1 %v2737_v10  ;;  %2244 = vmatprep.subr.bf16.mxu0 %v2663_v50 }
  0xc5   : > { %2150 = vmatpush3.bf16.xpose.msra.mxu1 %v2737_v10  ;;  %2246 = vmatpush3.bf16.xpose.msra.mxu0 %v2663_v50  ;;  %v1398_v50 = vlaneseq  ;;  %v2952_v10 = vld [vmem:[%s3108_s3] ss:$0 sm:$0xff] }
  0xc6   : > { %2152 = vmatprep.subr.bf16.mxu1 %v3128_v14  ;;  %2248 = vmatprep.subr.bf16.mxu0 %v3129_v15 }
  0xc7   : > { %v2945_v5 = vshrl.u32 %v1398_v50, 7 }
  0xc9   : > { %v1400_v9 = vadd.s32 8, %v2945_v5  ;;  %v1401_v28 = vadd.s32 16, %v2945_v5  ;;  %v1404_v57 = vadd.s32 40, %v2945_v5  ;;  %v1403_v61 = vadd.s32 32, %v2945_v5 }
  0xcd   : > { %2154 = vmatpush3.bf16.xpose.msra.mxu1 %v3128_v14  ;;  %2250 = vmatpush3.bf16.xpose.msra.mxu0 %v3129_v15 }
  0xce   : > { %2156 = vmatprep.subr.bf16.mxu1 %v3130_v22  ;;  %2252 = vmatprep.subr.bf16.mxu0 %v3131_v27 }
  0xd5   : > { %2158 = vmatpush3.bf16.xpose.msra.mxu1 %v3130_v22  ;;  %2254 = vmatpush3.bf16.xpose.msra.mxu0 %v3131_v27  ;;  %v1406_v27 = vadd.s32 56, %v2945_v5 }
  0xdc   : > { %1920 = vmatmul.mubr.f32.vlgmr.msra.gmra.mrb[0].mxu1 %v3132_v30  ;;  %2052 = vmatmul.mubr.f32.vlgmr.msra.gmra.mrb[0].mxu0 %v2762_v31  ;;  %v2954_v31 = vstv %s1648_s21  ;;  %v1405_v30 = vadd.s32 48, %v2945_v5 }
  0xdd   : > { %1922 = vmatprep.mubr.f32.mxu1 %v3133_v34  ;;  %2054 = vmatprep.mubr.f32.mxu0 %v2772_v40  ;;  %v1408_v52 = vadd.s32 %v2954_v31, %v2945_v5  ;;  %v1410_v49 = vadd.s32 %v2954_v31, %v1401_v28  ;;  %v1413_v60 = vadd.s32 %v2954_v31, %v1404_v57 }
  0xe0   : > { %1923 = vmatmul.mubr.f32.gmra.mrb[2].mxu1 %v3134_v43  ;;  %2055 = vmatmul.mubr.f32.gmra.mrb[2].mxu0 %v2781_v45 }
  0xe1   : > { %1925 = vmatprep.mubr.f32.mxu1 %v2809_v16  ;;  %2057 = vmatprep.mubr.f32.mxu0 %v2785_v46  ;;  %v1409_v46 = vadd.s32 %v2954_v31, %v1400_v9 }
  0xe2   : > { %v1332_v1 = vpop.permute.xlu1 %1331 }
  0xe3   : > { %v1367_v59 = vadd.f32 %v2952_v10, %v1332_v1 }
  0xe4   : > { %1926 = vmatmul.mubr.f32.gmra.mrb[4].mxu1 %v2820_v37  ;;  %2058 = vmatmul.mubr.f32.gmra.mrb[4].mxu0 %v2805_v12  ;;  %v2958_v12 = vand.u32 127, %v1398_v50 }
  0xe5   : > { %1928 = vmatprep.mubr.f32.mxu1 %v2831_v47  ;;  %2060 = vmatprep.mubr.f32.mxu0 %v2815_v32  ;;  %v1402_v47 = vadd.s32 24, %v2945_v5 }
  0xe6   : > { %vm1422_vm1 = vcmp.eq.s32.totalorder %v1409_v46, %v2958_v12  ;;  %vm1421_vm2 = vcmp.eq.s32.totalorder %v1408_v52, %v2958_v12  ;;  %vm1423_vm4 = vcmp.eq.s32.totalorder %v1410_v49, %v2958_v12  ;;  %vm1426_vm5 = vcmp.eq.s32.totalorder %v1413_v60, %v2958_v12 }
  0xe7   : > { %v1411_v53 = vadd.s32 %v2954_v31, %v1402_v47 }
  0xe8   : > { %1929 = vmatmul.mubr.f32.gmra.mrb[6].mxu1 %v2836_v44  ;;  %2061 = vmatmul.mubr.f32.gmra.mrb[6].mxu0 %v2822_v38 }
  0xe9   : > { %v1322_v4 = vpop.permute.xlu0 %1321  ;;  %v1337_v8 = vpop.permute.xlu1 %1336  ;;  %vm1424_vm3 = vcmp.eq.s32.totalorder %v1411_v53, %v2958_v12 }
  0xea   : > { %v1365_v37 = vadd.f32 %v2952_v10, %v1322_v4  ;;  %v1368_v6 = vadd.f32 %v2952_v10, %v1337_v8 }
  0xee   : > { %v1327_v40 = vpop.permute.xlu0 %1326  ;;  %v1347_v21 = vpop.permute.xlu1 %1346 }
  0xef   : > { %v1366_v44 = vadd.f32 %v2952_v10, %v1327_v40  ;;  %v1370_v11 = vadd.f32 %v2952_v10, %v1347_v21  ;;  %v1412_v40 = vadd.s32 %v2954_v31, %v1403_v61 }
  0xf1   : > { %vm1425_vm6 = vcmp.eq.s32.totalorder %v1412_v40, %v2958_v12 }
  0xf2   : > { %v1342_v55 = vpop.permute.xlu0 %1341  ;;  %v1357_v18 = vpop.permute.xlu1 %1356 }
  0xf3   : > { %v1369_v9 = vadd.f32 %v2952_v10, %v1342_v55 }
  0xf6   : > { %v1352_v46 = vpop.permute.xlu0 %1351 }
 0x1af   : > { %v1921_v41 = vpop.f32.mrb[0].mxu1  ;;  %v2053_v42 = vpop.f32.mrb[0].mxu0 }
 0x1b0   : > { %v2255_v45 = vadd.f32 %v2053_v42, %v1921_v41  ;;  %v822_v16 = vpop.f32.mrb[1].mxu1  ;;  %v1264_v32 = vpop.f32.mrb[1].mxu0 }
 0x1b1   : > { %v2256_v38 = vadd.f32 %v1264_v32, %v822_v16  ;;  %v1415_v16 = vadd.s32 %v2954_v31, %v1406_v27  ;;  %v1414_v32 = vadd.s32 %v2954_v31, %v1405_v30 }
 0x1b2   : > { %v1374_v39 = vmul.f32 2.0, %v2255_v45  ;;  %v1372_v45 = vadd.f32 %v2952_v10, %v1357_v18 }
 0x1b3   : > { %v1373_v51 = vmul.f32 2.0, %v2256_v38  ;;  %v1924_v58 = vpop.f32.mrb[2].mxu1  ;;  %v2056_v24 = vpop.f32.mrb[2].mxu0  ;;  %vm1428_vm8 = vcmp.eq.s32.totalorder %v1415_v16, %v2958_v12  ;;  %vm1427_vm9 = vcmp.eq.s32.totalorder %v1414_v32, %v2958_v12 }
 0x1b4   : > { %v1382_v63 = vsub.f32 %v1366_v44, %v1374_v39  ;;  %v2257_v0 = vadd.f32 %v2056_v24, %v1924_v58  ;;  %v836_v13 = vpop.f32.mrb[3].mxu1  ;;  %v1276_v33 = vpop.f32.mrb[3].mxu0  ;;  %v1371_v39 = vadd.f32 %v2952_v10, %v1352_v46 }
 0x1b5   : > { %v1381_v19 = vsub.f32 %v1365_v37, %v1373_v51  ;;  %v2258_v54 = vadd.f32 %v1276_v33, %v836_v13 }
 0x1b6   : > { %v1390_v56 = vmax.f32 %v1382_v63, 0.0  ;;  %v1376_v25 = vmul.f32 2.0, %v2257_v0 }
 0x1b7   : > { %v1389_v20 = vmax.f32 %v1381_v19, 0.0  ;;  %v1375_v23 = vmul.f32 2.0, %v2258_v54  ;;  %v1927_v2 = vpop.f32.mrb[4].mxu1  ;;  %v2059_v3 = vpop.f32.mrb[4].mxu0 }
 0x1b8   : > { %v2975_v48 = vsel %vm1422_vm1, 0.0, %v1390_v56  ;;  %v1384_v62 = vsub.f32 %v1368_v6, %v1376_v25  ;;  %v2259_v7 = vadd.f32 %v2059_v3, %v1927_v2  ;;  %v850_v29 = vpop.f32.mrb[5].mxu1  ;;  %v1288_v36 = vpop.f32.mrb[5].mxu0 }
 0x1b9   : > { %2355 = vrsqrt.f32 %v2975_v48  ;;  %v2983_v17 = vsel %vm1421_vm2, 0.0, %v1389_v20  ;;  %v1383_v26 = vsub.f32 %v1367_v59, %v1375_v23  ;;  %v2260_v1 = vadd.f32 %v1288_v36, %v850_v29 }
 0x1ba   : > { %v1392_v35 = vmax.f32 %v1384_v62, 0.0  ;;  %v1378_v14 = vmul.f32 2.0, %v2259_v7  ;;  %2357 = vrsqrt.f32 %v2983_v17  ;;  %vm1446_vm7 = vcmp.eq.f32.partialorder %v2975_v48, inf }
 0x1bb   : > { %v1930_v15 = vpop.f32.mrb[6].mxu1  ;;  %v2062_v22 = vpop.f32.mrb[6].mxu0  ;;  %v1391_v43 = vmax.f32 %v1383_v26, 0.0  ;;  %v1377_v5 = vmul.f32 2.0, %v2260_v1  ;;  %vm1448_vm10 = vcmp.eq.f32.partialorder %v2975_v48, 0.0  ;;  %v1449_v10 = vand.u32 2147483648, %v2975_v48 }
 0x1bc   : > { %v2989_v34 = vsel %vm1424_vm3, 0.0, %v1392_v35  ;;  %v1386_v50 = vsub.f32 %v1370_v11, %v1378_v14  ;;  %v864_v4 = vpop.f32.mrb[7].mxu1  ;;  %v1300_v8 = vpop.f32.mrb[7].mxu0  ;;  %v2261_v44 = vadd.f32 %v2062_v22, %v1930_v15  ;;  %vm1439_vm11 = vcmp.eq.f32.partialorder %v2983_v17, inf }
 0x1bd   : > { %2359 = vrsqrt.f32 %v2989_v34  ;;  %v2995_v41 = vsel %vm1423_vm4, 0.0, %v1391_v43  ;;  %v1385_v38 = vsub.f32 %v1369_v9, %v1377_v5  ;;  %v2262_v21 = vadd.f32 %v1300_v8, %v864_v4 }
 0x1be   : > { %v1394_v42 = vmax.f32 %v1386_v50, 0.0  ;;  %2361 = vrsqrt.f32 %v2995_v41  ;;  %v1380_v47 = vmul.f32 2.0, %v2261_v44  ;;  %vm1441_vm12 = vcmp.eq.f32.partialorder %v2983_v17, 0.0 }
 0x1bf   : > { %v1393_v51 = vmax.f32 %v1385_v38, 0.0  ;;  %v1379_v58 = vmul.f32 2.0, %v2262_v21  ;;  %v1442_v6 = vand.u32 2147483648, %v2983_v17  ;;  %vm1460_vm13 = vcmp.eq.f32.partialorder %v2989_v34, inf }
 0x1c0   : > { %v3001_v37 = vsel %vm1426_vm5, 0.0, %v1394_v42  ;;  %v1388_v52 = vsub.f32 %v1372_v45, %v1380_v47  ;;  %vm1462_vm14 = vcmp.eq.f32.partialorder %v2989_v34, 0.0  ;;  %v1463_v2 = vand.u32 2147483648, %v2989_v34 }
 0x1c1   : > { %2363 = vrsqrt.f32 %v3001_v37  ;;  %v1433_v28 = vsel %vm1425_vm6, 0.0, %v1393_v51  ;;  %v1387_v0 = vsub.f32 %v1371_v39, %v1379_v58  ;;  %vm1453_vm15 = vcmp.eq.f32.partialorder %v2995_v41, inf }
 0x1c2   : > { %v1396_v63 = vmax.f32 %v1388_v52, 0.0  ;;  %2365 = vrsqrt.f32 %v1433_v28  ;;  %v1456_v12 = vand.u32 2147483648, %v2995_v41  ;;  %vm1455_vm0 = vcmp.eq.f32.partialorder %v2995_v41, 0.0 }
 0x1c3   : > { %v2356_v24 = vpop.eup %2355  ;;  %v1395_v54 = vmax.f32 %v1387_v0, 0.0  ;;  %vm1474_vm1 = vcmp.eq.f32.partialorder %v3001_v37, inf  ;;  %vm1476_vm2 = vcmp.eq.f32.partialorder %v3001_v37, 0.0  ;;  %vm1467_vm3 = vcmp.eq.f32.partialorder %v1433_v28, inf }
 0x1c4   : > { %v1445_v31 = vmul.f32 %v2356_v24, %v2975_v48  ;;  %v2358_v13 = vpop.eup %2357  ;;  %v1436_v53 = vsel %vm1428_vm8, 0.0, %v1396_v63  ;;  %v1470_v30 = vand.u32 2147483648, %v1433_v28  ;;  %vm1469_vm4 = vcmp.eq.f32.partialorder %v1433_v28, 0.0 }
 0x1c5   : > { %v1438_v19 = vmul.f32 %v2358_v13, %v2983_v17  ;;  %2367 = vrsqrt.f32 %v1436_v53  ;;  %v1435_v3 = vsel %vm1427_vm9, 0.0, %v1395_v54  ;;  %vm1488_vm5 = vcmp.eq.f32.partialorder %v1436_v53, inf }
 0x1c6   : > { %v1447_v33 = vsel %vm1446_vm7, %v2975_v48, %v1445_v31  ;;  %2369 = vrsqrt.f32 %v1435_v3  ;;  %v1491_v1 = vand.u32 2147483648, %v1436_v53  ;;  %vm1490_vm6 = vcmp.eq.f32.partialorder %v1436_v53, 0.0 }
 0x1c7   : > { %v2360_v57 = vpop.eup %2359  ;;  %v1450_v59 = vsel %vm1448_vm10, %v1449_v10, %v1447_v33  ;;  %v1440_v25 = vsel %vm1439_vm11, %v2983_v17, %v1438_v19  ;;  %v1477_v17 = vand.u32 2147483648, %v3001_v37  ;;  %vm1481_vm7 = vcmp.eq.f32.partialorder %v1435_v3, inf }
 0x1c8   : > { %v1494_v56 = vsub.f32 0.0, %v1450_v59  ;;  %v1459_v20 = vmul.f32 %v2360_v57, %v2989_v34  ;;  %v2362_v23 = vpop.eup %2361  ;;  %v1443_v49 = vsel %vm1441_vm12, %v1442_v6, %v1440_v25  ;;  %v1484_v5 = vand.u32 2147483648, %v1435_v3 }
 0x1c9   : > { %v1493_v11 = vsub.f32 0.0, %v1443_v49  ;;  %v1452_v62 = vmul.f32 %v2362_v23, %v2995_v41  ;;  %vm1483_vm8 = vcmp.eq.f32.partialorder %v1435_v3, 0.0 }
 0x1ca   : > { %1502 = vst [vmem:[%s3027_s24 + $0x8] sm:$0xff] %v1494_v56  ;;  %v1461_v48 = vsel %vm1460_vm13, %v2989_v34, %v1459_v20 }
 0x1cb   : > { %v2364_v7 = vpop.eup %2363  ;;  %v1464_v29 = vsel %vm1462_vm14, %v1463_v2, %v1461_v48  ;;  %1501 = vst [vmem:[%s3027_s24] sm:$0xff] %v1493_v11  ;;  %v1454_v55 = vsel %vm1453_vm15, %v2995_v41, %v1452_v62 }
 0x1cc   : > { %v1496_v36 = vsub.f32 0.0, %v1464_v29  ;;  %v1473_v60 = vmul.f32 %v2364_v7, %v3001_v37  ;;  %v1457_v61 = vsel %vm1455_vm0, %v1456_v12, %v1454_v55  ;;  %v2366_v26 = vpop.eup %2365 }
 0x1cd   : > { %v1495_v18 = vsub.f32 0.0, %v1457_v61  ;;  %v1466_v22 = vmul.f32 %v2366_v26, %v1433_v28 }
 0x1ce   : > { %1504 = vst [vmem:[%s3027_s24 + $0x18] sm:$0xff] %v1496_v36  ;;  %v1475_v35 = vsel %vm1474_vm1, %v3001_v37, %v1473_v60 }
 0x1cf   : > { %v1478_v14 = vsel %vm1476_vm2, %v1477_v17, %v1475_v35  ;;  %1503 = vst [vmem:[%s3027_s24 + $0x10] sm:$0xff] %v1495_v18  ;;  %v2368_v27 = vpop.eup %2367  ;;  %v1468_v34 = vsel %vm1467_vm3, %v1433_v28, %v1466_v22 }
 0x1d0   : > { %v1498_v15 = vsub.f32 0.0, %v1478_v14  ;;  %v1487_v43 = vmul.f32 %v2368_v27, %v1436_v53  ;;  %v1471_v50 = vsel %vm1469_vm4, %v1470_v30, %v1468_v34  ;;  %v2370_v4 = vpop.eup %2369 }
 0x1d1   : > { %v1497_v8 = vsub.f32 0.0, %v1471_v50  ;;  %v1480_v41 = vmul.f32 %v2370_v4, %v1435_v3 }
 0x1d2   : > { %1506 = vst [vmem:[%s3027_s24 + $0x28] sm:$0xff] %v1498_v15  ;;  %v1489_v9 = vsel %vm1488_vm5, %v1436_v53, %v1487_v43 }
 0x1d3   : > { %v1492_v40 = vsel %vm1490_vm6, %v1491_v1, %v1489_v9  ;;  %1505 = vst [vmem:[%s3027_s24 + $0x20] sm:$0xff] %v1497_v8  ;;  %v1482_v44 = vsel %vm1481_vm7, %v1435_v3, %v1480_v41 }
 0x1d4   : > { %v1500_v42 = vsub.f32 0.0, %v1492_v40  ;;  %v1485_v45 = vsel %vm1483_vm8, %v1484_v5, %v1482_v44 }
 0x1d5   : > { %v1499_v46 = vsub.f32 0.0, %v1485_v45 }
 0x1d6   : > { %1508 = vst [vmem:[%s3027_s24 + $0x38] sm:$0xff] %v1500_v42 }
 0x1d7   : > { %1507 = vst [vmem:[%s3027_s24 + $0x30] sm:$0xff] %v1499_v46 }
 0x1d8   : > { %2384 = shalt.err (!%p2381_p5)
}
 0x1d9   : > { %s2385_s12 = scalar_lea.hbm %s3052_s8, 1024  ;;  %s2389_s13 = scalar_lea.hbm %s3109_s4, 2048 }
 0x1da   : > { %p2386_p6 = scmp.ne.s32.totalorder %s3052_s8, %s2385_s12  ;;  %p2390_p10 = scmp.lt.u32.totalorder %s3052_s8, %s3109_s4 }
 0x1db   : > { %p2391_p11 = scmp.lt.u32.totalorder %s2389_s13, %s2385_s12  ;;  %p2393_p13 = scmp.lt.u32.totalorder %s2385_s12, %s3052_s8 }
 0x1dc   : > { %p2387_p7 = pnand %p2386_p6, %p2520_p4 }
 0x1dd   : > { %p2392_p12 = por %p2391_p11, %p2390_p10 }
 0x1de   : > { %p2388_p9 = pneg %p2387_p7 }
 0x1df   : > { %p2394_p0 = por %p2393_p13, %p2392_p12 }
 0x1e1   : > { %p2395_p1 = pnand %p2394_p0, %p2388_p9 }
 0x1e3   : > { %2398 = shalt.err (!%p2395_p1)
}
 0x1e4   : > { %s2453_s24 = smov 128   ;;  %s2454_s26 = smov 8  }
 0x1e5   : > { %2295 = dma.vmem_to_hbm [thread:$0]  (%p2520_p4), %s3054_s29, 1024, %s3052_s8, %s3059_s18, %s2453_s24, %s2453_s24, %s2454_s26  }
 0x1e6 PF: > { %p2301_p2 = scmp.ge.s32.totalorder %s2449_s20, 2  ;;  %s1539_s5 = sand.u32 1, %s2429_s15  }
 0x1e7   : > { %s1540_s6 = scalar_lea.sflag [#allocation3], %s1539_s5 }
 0x1e8   : > { %p2298_p3 = pnand %p2301_p2, %p2527_p8 }
 0x1ea   : > { %2424 = dma.done.wait (!%p2298_p3), %s1540_s6, 1024  }
 0x1eb   : > { %2426 = vsyncadd (!%p2298_p3), %s1540_s6, 4294966272  ;;  %s17_s20 = sadd.s32 1, %s2449_s20   ;;  %s3135_s15 = smov %s2433_s16 }
 0x1ec   : > { %p14_p5 = scmp.ge.s32.totalorder %s17_s20, 4   ;;  %s3136_s16 = smov %s2437_s17 }
 0x1ed   : > { %s3137_s17 = smov %s2533_s28  ;;  %s3138_s18 = smov %s2445_s19 }
 0x1ee   : > { %s3139_s19 = smov %s3141_s23  ;;  %16 = sbr.rel (!%p14_p5) target bundleno = 4 (0x4), region = 80 }
 0x1f5   :  { %1545 = vsyncpa [#allocation3], 1 }
 0x1f6   :  { %1547 = vsyncpa [#allocation3 + $0x1], 1 }

</bundles_post_ra>
